<compile_context>
chip_gen: v7x
topology: tpu7x:2x2x1
jax: 0.10.0
libtpu: 0.0.40
codegen_flags: <defaults>
</compile_context>

<pallas_src>
import math

import jax
import jax.numpy as jnp
from jax.experimental import pallas as pl
from jax.experimental.pallas import tpu as pltpu


def _round_up(v, m):
    return (v + m - 1) // m * m


def _linear_kernel(x_ref, wt_ref, b_ref, h_ref):
    # H tile = x_tile @ W^T + b ; bf16 MXU inputs, f32 accumulation, bf16 store.
    h = jnp.dot(x_ref[...], wt_ref[...], preferred_element_type=jnp.float32)
    h_ref[...] = (h + b_ref[...]).astype(h_ref.dtype)


def _spmm_kernel(adj_ref, h_ref, out_ref, acc_ref):
    # out_tile = sum_k adj[i, k] @ H[k, :], accumulated in f32 VMEM scratch.
    @pl.when(pl.program_id(1) == 0)
    def _():
        acc_ref[...] = jnp.zeros_like(acc_ref)

    acc_ref[...] += jnp.dot(adj_ref[...], h_ref[...],
                            preferred_element_type=jnp.float32)

    @pl.when(pl.program_id(1) == pl.num_programs(1) - 1)
    def _():
        out_ref[...] = acc_ref[...].astype(out_ref.dtype)


def gcn_conv(adj, x, weight, bias, *, tm=256, tk=512):
    """adj: [N, N], x: [N, F_in], weight: [F_out, F_in], bias: [F_out]."""
    n, f_in = x.shape
    f_out = weight.shape[0]

    # Lane-dense padded feature dims (multiples of 128).
    f_in_p = _round_up(f_in, 128)
    f_out_p = _round_up(f_out, 128)

    # Clamp tile sizes for small problems; pad N so both tiles divide it.
    # TODO(synk): for v7x consider pipeline_mode=pl.Buffered(3) on the adj spec.
    n_min = _round_up(n, 128)
    tm = min(tm, n_min)
    tk = min(tk, n_min)
    n_p = _round_up(n, math.lcm(tm, tk))

    # Pad + cast matmul operands to bf16 (f32 accumulation preserves accuracy).
    adj_p = jnp.pad(adj, ((0, n_p - n), (0, n_p - n))).astype(jnp.bfloat16)
    x_p = jnp.pad(x, ((0, n_p - n), (0, f_in_p - f_in))).astype(jnp.bfloat16)
    # Pre-transpose W in the wrapper -> [F_in, F_out]; kernel does no .T.
    wt_p = jnp.pad(
        weight.T, ((0, f_in_p - f_in), (0, f_out_p - f_out))
    ).astype(jnp.bfloat16)
    b_p = jnp.pad(bias, (0, f_out_p - f_out)).reshape(1, f_out_p).astype(jnp.float32)

    # ---------- Stage 1: H = x @ W^T + b (computed once, row-tiled) ----------
    h = pl.pallas_call(
        _linear_kernel,
        out_shape=jax.ShapeDtypeStruct((n_p, f_out_p), jnp.bfloat16),
        grid_spec=pltpu.PrefetchScalarGridSpec(
            num_scalar_prefetch=0,
            grid=(n_p // tm,),
            in_specs=[
                pl.BlockSpec((tm, f_in_p), lambda i: (i, 0)),        # x rows
                pl.BlockSpec((f_in_p, f_out_p), lambda i: (0, 0)),   # W^T (resident)
                pl.BlockSpec((1, f_out_p), lambda i: (0, 0)),        # bias
            ],
            out_specs=pl.BlockSpec((tm, f_out_p), lambda i: (i, 0)),
        ),
        compiler_params=pltpu.CompilerParams(
            dimension_semantics=("parallel",)),
        cost_estimate=pl.CostEstimate(
            flops=2 * n_p * f_in_p * f_out_p,
            transcendentals=0,
            bytes_accessed=(x_p.size * 2 + wt_p.size * 2 + b_p.size * 4
                            + n_p * f_out_p * 2),
        ),
    )(x_p, wt_p, b_p)

    # ---------- Stage 2: out = adj @ H (tiled (row, k) reduction) ----------
    out_p = pl.pallas_call(
        _spmm_kernel,
        out_shape=jax.ShapeDtypeStruct((n_p, f_out_p), jnp.float32),
        grid_spec=pltpu.PrefetchScalarGridSpec(
            num_scalar_prefetch=0,
            grid=(n_p // tm, n_p // tk),
            in_specs=[
                pl.BlockSpec((tm, tk), lambda i, k: (i, k)),          # adj tile
                pl.BlockSpec((tk, f_out_p), lambda i, k: (k, 0)),     # H slab
            ],
            out_specs=pl.BlockSpec((tm, f_out_p), lambda i, k: (i, 0)),
            scratch_shapes=[pltpu.VMEM((tm, f_out_p), jnp.float32)],
        ),
        compiler_params=pltpu.CompilerParams(
            dimension_semantics=("parallel", "arbitrary")),
        cost_estimate=pl.CostEstimate(
            flops=2 * n_p * n_p * f_out_p,
            transcendentals=0,
            bytes_accessed=(adj_p.size * 2 + n_p * f_out_p * 2
                            + n_p * f_out_p * 4),
        ),
    )(adj_p, h)

    return out_p[:n, :f_out]


if __name__ == "__main__":
    # Small deterministic problem: N=8 nodes, in_channels=32, out_channels=32.
    N, F_IN, F_OUT = 8, 32, 32

    key = jax.random.PRNGKey(0)
    k_adj, k_x, k_w, k_b = jax.random.split(key, 4)

    # Symmetric dense adjacency (deterministic).
    a = jax.random.uniform(k_adj, (N, N), dtype=jnp.float32)
    adj = (a + a.T) * 0.5

    x = jax.random.normal(k_x, (N, F_IN), dtype=jnp.float32)

    # nn.Linear(in_channels, out_channels) parameter shapes, PyTorch-like init.
    bound = 1.0 / (F_IN ** 0.5)
    weight = jax.random.uniform(
        k_w, (F_OUT, F_IN), minval=-bound, maxval=bound, dtype=jnp.float32
    )
    bias = jax.random.uniform(
        k_b, (F_OUT,), minval=-bound, maxval=bound, dtype=jnp.float32
    )

    out = jax.block_until_ready(gcn_conv(adj, x, weight, bias))

    # Reference check (plain JAX, f32) — same math as torch forward.
    ref = adj @ (x @ weight.T + bias)
    assert out.shape == (N, F_OUT)
    # bf16 MXU inputs with f32 accumulation -> loosened tolerance vs f32 ref.
    assert jnp.allclose(out, ref, atol=2e-2, rtol=2e-2), "mismatch vs reference"

    print("KERNEL_OK")
</pallas_src>

<mosaic_0001>
module attributes {stable_mosaic.version = 11 : i64} {
  func.func @_linear_kernel(%arg0: i32, %arg1: memref<128x128xbf16, #tpu.memory_space<vmem>>, %arg2: memref<128x128xbf16, #tpu.memory_space<vmem>>, %arg3: memref<1x128xf32, #tpu.memory_space<vmem>>, %arg4: memref<128x128xbf16, #tpu.memory_space<vmem>>) attributes {dimension_semantics = [#tpu.dimension_semantics<parallel>], iteration_bounds = array<i64: 1>, scalar_prefetch = 0 : i64, scratch_operands = 0 : i64, tpu.core_type = #tpu.core_type<tc>, window_params = [{transform_indices = @transform_0, window_bounds = array<i64: 128, 128>}, {pipeline_mode = #tpu.pipeline_mode<synchronous>, transform_indices = @transform_1, window_bounds = array<i64: 128, 128>}, {pipeline_mode = #tpu.pipeline_mode<synchronous>, transform_indices = @transform_2, window_bounds = array<i64: 1, 128>}, {transform_indices = @transform_3, window_bounds = array<i64: 128, 128>}]} {
    %c0 = arith.constant 0 : index
    %c0_0 = arith.constant 0 : index
    %0 = vector.load %arg1[%c0, %c0_0] : memref<128x128xbf16, #tpu.memory_space<vmem>>, vector<128x128xbf16>
    %c0_1 = arith.constant 0 : index
    %c0_2 = arith.constant 0 : index
    %1 = vector.load %arg2[%c0_1, %c0_2] : memref<128x128xbf16, #tpu.memory_space<vmem>>, vector<128x128xbf16>
    %cst = arith.constant dense<0.000000e+00> : vector<128x128xf32>
    %2 = tpu.matmul %0, %1, %cst {dimension_numbers = #tpu.dot_dimension_numbers<[1], [0], [0], [1], [0, 0, 1, 1], [], []>} : vector<128x128xbf16>, vector<128x128xbf16>, vector<128x128xf32> -> vector<128x128xf32>
    %c0_3 = arith.constant 0 : index
    %c0_4 = arith.constant 0 : index
    %3 = vector.load %arg3[%c0_3, %c0_4] : memref<1x128xf32, #tpu.memory_space<vmem>>, vector<1x128xf32>
    %4 = vector.broadcast %3 : vector<1x128xf32> to vector<128x128xf32>
    %5 = arith.addf %2, %4 : vector<128x128xf32>
    %6 = arith.truncf %5 : vector<128x128xf32> to vector<128x128xbf16>
    %c0_5 = arith.constant 0 : index
    %c0_6 = arith.constant 0 : index
    %7 = vector.load %arg4[%c0_5, %c0_6] : memref<128x128xbf16, #tpu.memory_space<vmem>>, vector<128x128xbf16>
    tpu.vector_store %arg4[%c0_5, %c0_6], %6 {strides = array<i32>} : memref<128x128xbf16, #tpu.memory_space<vmem>>, vector<128x128xbf16>,
    return
  }
  func.func @transform_0(%arg0: i32) -> (i32, i32) {
    %c0_i32 = arith.constant 0 : i32
    %c0_i32_0 = arith.constant 0 : i32
    return %arg0, %c0_i32 : i32, i32
  }
  func.func @transform_1(%arg0: i32) -> (i32, i32) {
    %c0_i32 = arith.constant 0 : i32
    %c0_i32_0 = arith.constant 0 : i32
    %c0_i32_1 = arith.constant 0 : i32
    return %c0_i32, %c0_i32_0 : i32, i32
  }
  func.func @transform_2(%arg0: i32) -> (i32, i32) {
    %c0_i32 = arith.constant 0 : i32
    %c0_i32_0 = arith.constant 0 : i32
    %c0_i32_1 = arith.constant 0 : i32
    return %c0_i32, %c0_i32_0 : i32, i32
  }
  func.func @transform_3(%arg0: i32) -> (i32, i32) {
    %c0_i32 = arith.constant 0 : i32
    %c0_i32_0 = arith.constant 0 : i32
    return %arg0, %c0_i32 : i32, i32
  }
}

</mosaic_0001>

<bundles_post_ra>
// kernel: tpu_custom_call.1
= control target key start
LH: loop header
LB: loop body
LE: loop exit
PB: predicated region body
PF: predicated region fallthrough
CT: control target
= control target key end

     0   :  { %8 = vsyncpa [#allocation3], 0  ;;  %s700_s0 = inlined_call_operand.hbm [shape: bf16[128,128], index: 0, kind: input, shape index: {}]   ;;  %s701_s1 = inlined_call_operand.hbm [shape: bf16[128,128], index: 1, kind: input, shape index: {}]   ;;  %s702_s2 = inlined_call_operand.vmem [shape: f32[1,128], index: 2, kind: input, shape index: {}]   ;;  %s703_s3 = inlined_call_operand.hbm [shape: bf16[128,128], index: 3, kind: output, shape index: {}]  }
   0x1   :  { %9 = vsyncpa [#allocation6], 0 }
   0x2   :  { %10 = vsyncpa [#allocation4], 0  ;;  %s627_s12 = smov [#allocation2]   ;;  %s555_s16 = scalar_lea.hbm %s700_s0, 1024 }
   0x3   :  { %s16_s13 = sshll.u32 %s627_s12, 4  ;;  %p556_p0 = scmp.ne.s32.totalorder %s700_s0, %s555_s16  ;;  %s17_s13 = int_to_ptr.vmem [resolvable:$true] %s16_s13 }
   0x4   :  { %p559_p1 = scmp.lt.u32.totalorder %s555_s16, %s700_s0 }
   0x6   :  { %p561_p2 = pnand %p559_p1, %p556_p0 }
   0x8   :  { %564 = shalt.err (!%p561_p2)
}
   0x9   :  { %s565_s21 = scalar_lea.vmem %s17_s13, 1024  ;;  %p570_p4 = scmp.lt.s32.totalorder %s17_s13, %s17_s13 }
   0xa   :  { %p566_p3 = scmp.ne.s32.totalorder %s17_s13, %s565_s21  ;;  %p571_p5 = scmp.lt.s32.totalorder %s565_s21, %s565_s21 }
   0xc   :  { %p572_p6 = por %p571_p5, %p570_p4 }
   0xe   :  { %p573_p7 = pnand %p572_p6, %p566_p3 }
  0x10   :  { %576 = shalt.err (!%p573_p7)
}
  0x11   :  { %s628_s22 = smov 64   ;;  %s629_s23 = smov 4  }
  0x12   :  { %22 = dma.hbm_to_vmem [thread:$0]  %s700_s0, 1024, %s17_s13, [#allocation3], %s628_s22, %s628_s22, %s629_s23  }
  0x13   :  { %s630_s26 = smov [#allocation5]   ;;  %s577_s30 = scalar_lea.hbm %s701_s1, 1024 }
  0x14   :  { %s28_s27 = sshll.u32 %s630_s26, 4  ;;  %p578_p8 = scmp.ne.s32.totalorder %s701_s1, %s577_s30  ;;  %s29_s27 = int_to_ptr.vmem [resolvable:$true] %s28_s27 }
  0x15   :  { %p581_p9 = scmp.lt.u32.totalorder %s577_s30, %s701_s1 }
  0x17   :  { %p583_p10 = pnand %p581_p9, %p578_p8 }
  0x19   :  { %586 = shalt.err (!%p583_p10)
}
  0x1a   :  { %s587_s8 = scalar_lea.vmem %s29_s27, 1024  ;;  %p592_p12 = scmp.lt.s32.totalorder %s29_s27, %s29_s27 }
  0x1b   :  { %p588_p11 = scmp.ne.s32.totalorder %s29_s27, %s587_s8  ;;  %p593_p13 = scmp.lt.s32.totalorder %s587_s8, %s587_s8 }
  0x1d   :  { %p594_p0 = por %p593_p13, %p592_p12 }
  0x1f   :  { %p595_p1 = pnand %p594_p0, %p588_p11 }
  0x21   :  { %598 = shalt.err (!%p595_p1)
}
  0x22   :  { %34 = dma.hbm_to_vmem [thread:$0]  %s701_s1, 1024, %s29_s27, [#allocation6], %s628_s22, %s628_s22, %s629_s23  }
  0x23   :  { %621 = dma.done.wait [#allocation3], 1024  }
  0x24   :  { %622 = vsyncadd [#allocation3], 4294966272 }
  0x25   :  { %623 = dma.done.wait [#allocation6], 1024  }
  0x26   :  { %624 = vsyncadd [#allocation6], 4294966272  ;;  %v539_v0 = vld [vmem:[#allocation5] sm:$0xff]   ;;  %v540_v1 = vld [vmem:[#allocation5 + $0x8] sm:$0xff]  }
  0x27   :  { %486 = vmatprep.subr.bf16.mxu0 %v539_v0  ;;  %518 = vmatprep.subr.bf16.mxu1 %v539_v0  ;;  %v541_v2 = vld [vmem:[#allocation5 + $0x10] sm:$0xff]   ;;  %v542_v3 = vld [vmem:[#allocation5 + $0x18] sm:$0xff]   ;;  %v547_v4 = vld [vmem:[#allocation2] sm:$0xff]  }
  0x28   :  { %487 = vmatpush3.bf16.msra.mxu0 %v539_v0  ;;  %526 = vmatpush3.bf16.msra.mxu1 %v539_v0  ;;  %v548_v5 = vld [vmem:[#allocation2 + $0x20] sm:$0xff]   ;;  %v544_v7 = vld [vmem:[#allocation5 + $0x28] sm:$0xff]   ;;  %v545_v8 = vld [vmem:[#allocation5 + $0x30] sm:$0xff]  }
  0x29   :  { %488 = vmatprep.subr.bf16.mxu0 %v540_v1  ;;  %519 = vmatprep.subr.bf16.mxu1 %v540_v1  ;;  %v543_v6 = vld [vmem:[#allocation5 + $0x20] sm:$0xff]   ;;  %v546_v9 = vld [vmem:[#allocation5 + $0x38] sm:$0xff]   ;;  %v549_v10 = vld [vmem:[#allocation2 + $0x8] sm:$0xff]  }
  0x2a   :  { %502 = vmatprep.mubr.bf16.mxu0 %v547_v4  ;;  %510 = vmatprep.mubr.bf16.mxu1 %v548_v5  ;;  %v550_v11 = vld [vmem:[#allocation2 + $0x28] sm:$0xff]   ;;  %v551_v12 = vld [vmem:[#allocation2 + $0x10] sm:$0xff]   ;;  %v553_v14 = vld [vmem:[#allocation2 + $0x18] sm:$0xff]  }
  0x2b   :  { %v552_v13 = vld [vmem:[#allocation2 + $0x30] sm:$0xff]   ;;  %v554_v15 = vld [vmem:[#allocation2 + $0x38] sm:$0xff]   ;;  %v374_v17 = vld [vmem:[%s702_s2] ss:$0 sm:$0xff]  ;;  %s631_s2 = smov [#allocation7]  }
  0x2c   :  { %489 = vmatpush3.bf16.msra.mxu0 %v540_v1  ;;  %527 = vmatpush3.bf16.msra.mxu1 %v540_v1  ;;  %s361_s11 = sshll.u32 %s631_s2, 4  ;;  %s362_s11 = int_to_ptr.vmem [resolvable:$true] %s361_s11 }
  0x2d   :  { %490 = vmatprep.subr.bf16.mxu0 %v541_v2  ;;  %520 = vmatprep.subr.bf16.mxu1 %v541_v2  ;;  %s599_s12 = scalar_lea.vmem %s362_s11, 1024  ;;  %p604_p3 = scmp.lt.s32.totalorder %s362_s11, %s362_s11 }
  0x2e   :  { %p600_p2 = scmp.ne.s32.totalorder %s362_s11, %s599_s12  ;;  %p605_p4 = scmp.lt.s32.totalorder %s599_s12, %s599_s12 }
  0x30   :  { %491 = vmatpush3.bf16.msra.mxu0 %v541_v2  ;;  %528 = vmatpush3.bf16.msra.mxu1 %v541_v2  ;;  %p606_p5 = por %p605_p4, %p604_p3 }
  0x31   :  { %492 = vmatprep.subr.bf16.mxu0 %v542_v3  ;;  %521 = vmatprep.subr.bf16.mxu1 %v542_v3 }
  0x32   :  { %p607_p6 = pnand %p606_p5, %p600_p2 }
  0x34   :  { %493 = vmatpush3.bf16.msra.mxu0 %v542_v3  ;;  %529 = vmatpush3.bf16.msra.mxu1 %v542_v3 }
  0x35   :  { %494 = vmatprep.subr.bf16.mxu0 %v543_v6  ;;  %522 = vmatprep.subr.bf16.mxu1 %v543_v6 }
  0x38   :  { %495 = vmatpush3.bf16.msra.mxu0 %v543_v6  ;;  %530 = vmatpush3.bf16.msra.mxu1 %v543_v6 }
  0x39   :  { %496 = vmatprep.subr.bf16.mxu0 %v544_v7  ;;  %523 = vmatprep.subr.bf16.mxu1 %v544_v7 }
  0x3c   :  { %497 = vmatpush3.bf16.msra.mxu0 %v544_v7  ;;  %531 = vmatpush3.bf16.msra.mxu1 %v544_v7 }
  0x3d   :  { %498 = vmatprep.subr.bf16.mxu0 %v545_v8  ;;  %524 = vmatprep.subr.bf16.mxu1 %v545_v8 }
  0x40   :  { %499 = vmatpush3.bf16.msra.mxu0 %v545_v8  ;;  %532 = vmatpush3.bf16.msra.mxu1 %v545_v8 }
  0x41   :  { %500 = vmatprep.subr.bf16.mxu0 %v546_v9  ;;  %525 = vmatprep.subr.bf16.mxu1 %v546_v9 }
  0x44   :  { %501 = vmatpush3.bf16.msra.mxu0 %v546_v9  ;;  %533 = vmatpush3.bf16.msra.mxu1 %v546_v9 }
  0x47   :  { %503 = vmatmul.mubr.bf16.vlgmr.msra.gmra.mrb[0].mxu0 %v549_v10  ;;  %511 = vmatmul.mubr.bf16.vlgmr.msra.gmra.mrb[0].mxu1 %v550_v11 }
  0x48   :  { %506 = vmatprep.mubr.bf16.mxu0 %v551_v12  ;;  %514 = vmatprep.mubr.bf16.mxu1 %v552_v13 }
  0x4f   :  { %507 = vmatmul.mubr.bf16.gmra.mrb[4].mxu0 %v553_v14  ;;  %515 = vmatmul.mubr.bf16.gmra.mrb[4].mxu1 %v554_v15 }
 0x11a   :  { %v504_v16 = vpop.f32.mrb[0].mxu0  ;;  %v512_v18 = vpop.f32.mrb[0].mxu1 }
 0x11b   :  { %v213_v19 = vpop.f32.mrb[1].mxu0  ;;  %v245_v20 = vpop.f32.mrb[1].mxu1  ;;  %v222_v23 = vadd.f32 %v504_v16, %v374_v17  ;;  %v254_v24 = vadd.f32 %v512_v18, %v374_v17 }
 0x11c   :  { %v505_v21 = vpop.f32.mrb[2].mxu0  ;;  %v513_v22 = vpop.f32.mrb[2].mxu1  ;;  %v214_v29 = vadd.f32 %v374_v17, %v213_v19  ;;  %v246_v30 = vadd.f32 %v374_v17, %v245_v20 }
 0x11d   :  { %v225_v25 = vadd.f32 %v505_v21, %v374_v17  ;;  %v257_v26 = vadd.f32 %v513_v22, %v374_v17  ;;  %v216_v27 = vpop.f32.mrb[3].mxu0  ;;  %v248_v28 = vpop.f32.mrb[3].mxu1 }
 0x11e   :  { %v217_v31 = vadd.f32 %v374_v17, %v216_v27  ;;  %v249_v32 = vadd.f32 %v374_v17, %v248_v28 }
 0x11f   :  { %v431_v33 = vpack.c.bf16 %v225_v25, %v222_v23  ;;  %v451_v34 = vpack.c.bf16 %v257_v26, %v254_v24 }
 0x120   :  { %v426_v35 = vpack.c.bf16 %v217_v31, %v214_v29  ;;  %v446_v36 = vpack.c.bf16 %v249_v32, %v246_v30 }
 0x121   :  { %463 = vst [vmem:[#allocation7 + $0x8] sm:$0xff] %v431_v33   ;;  %467 = vst [vmem:[#allocation7 + $0x28] sm:$0xff] %v451_v34  }
 0x122   :  { %427 = vst [vmem:[#allocation7] sm:$0xff] %v426_v35   ;;  %466 = vst [vmem:[#allocation7 + $0x20] sm:$0xff] %v446_v36   ;;  %v508_v37 = vpop.f32.mrb[4].mxu0  ;;  %v516_v38 = vpop.f32.mrb[4].mxu1 }
 0x123   :  { %v229_v39 = vpop.f32.mrb[5].mxu0  ;;  %v261_v40 = vpop.f32.mrb[5].mxu1  ;;  %v238_v43 = vadd.f32 %v508_v37, %v374_v17  ;;  %v270_v44 = vadd.f32 %v516_v38, %v374_v17 }
 0x124   :  { %v509_v41 = vpop.f32.mrb[6].mxu0  ;;  %v517_v42 = vpop.f32.mrb[6].mxu1  ;;  %v230_v49 = vadd.f32 %v374_v17, %v229_v39  ;;  %v262_v50 = vadd.f32 %v374_v17, %v261_v40 }
 0x125   :  { %v241_v45 = vadd.f32 %v509_v41, %v374_v17  ;;  %v273_v46 = vadd.f32 %v517_v42, %v374_v17  ;;  %v232_v47 = vpop.f32.mrb[7].mxu0  ;;  %v264_v48 = vpop.f32.mrb[7].mxu1 }
 0x126   :  { %v233_v51 = vadd.f32 %v374_v17, %v232_v47  ;;  %v265_v52 = vadd.f32 %v374_v17, %v264_v48 }
 0x127   :  { %v441_v53 = vpack.c.bf16 %v241_v45, %v238_v43  ;;  %v461_v54 = vpack.c.bf16 %v273_v46, %v270_v44 }
 0x128   :  { %v436_v55 = vpack.c.bf16 %v233_v51, %v230_v49  ;;  %v456_v56 = vpack.c.bf16 %v265_v52, %v262_v50 }
 0x129   :  { %465 = vst [vmem:[#allocation7 + $0x18] sm:$0xff] %v441_v53   ;;  %469 = vst [vmem:[#allocation7 + $0x38] sm:$0xff] %v461_v54  }
 0x12a   :  { %464 = vst [vmem:[#allocation7 + $0x10] sm:$0xff] %v436_v55   ;;  %468 = vst [vmem:[#allocation7 + $0x30] sm:$0xff] %v456_v56  }
 0x12b   :  { %610 = shalt.err (!%p607_p6)
}
 0x12c   :  { %s611_s15 = scalar_lea.hbm %s703_s3, 1024 }
 0x12d   :  { %p612_p7 = scmp.ne.s32.totalorder %s703_s3, %s611_s15  ;;  %p615_p8 = scmp.lt.u32.totalorder %s611_s15, %s703_s3 }
 0x12f   :  { %p617_p9 = pnand %p615_p8, %p612_p7 }
 0x131   :  { %620 = shalt.err (!%p617_p9)
}
 0x132   :  { %367 = dma.vmem_to_hbm [thread:$0]  %s362_s11, 1024, %s703_s3, [#allocation4], %s628_s22, %s628_s22, %s629_s23  }
 0x133   :  { %625 = dma.done.wait [#allocation4], 1024  }
 0x134   :  { %626 = vsyncadd [#allocation4], 4294966272 }
 0x135   :  { %371 = vsyncpa [#allocation3], 1 }
 0x136   :  { %372 = vsyncpa [#allocation6], 1 }
 0x137   :  { %373 = vsyncpa [#allocation4], 1 }

</bundles_post_ra>
